<compile_context>
chip_gen: v6e
topology: v6e:2x2x1
jax: 0.10.0
libtpu: 0.0.40
codegen_flags: <defaults>
</compile_context>

<pallas_src>
from typing import NamedTuple

import jax
import jax.numpy as jnp
from jax.experimental import pallas as pl
from jax.experimental.pallas import tpu as pltpu

LANE = 128
SUBLANE = 8
MAX_BATCH_TILE = 512   # measured: tile 512 ~ 85% of HBM roofline; keeps v7x VMEM modest


def _round_up(x, m):
    return ((x + m - 1) // m) * m


def _cdiv(a, b):
    return (a + b - 1) // b


# ----------------------------------------------------------------------------
# Kernel
# ----------------------------------------------------------------------------
def _make_mlp_kernel(num_layers, compute_dtype):
    """Fused Linear(+ReLU) stack over one batch tile.

    refs = (x_ref, W0, b0, W1, b1, ..., Wh, bh, o_ref).
    Weights already in `compute_dtype`; biases f32.  Matmuls accumulate in f32
    on the MXU; bias-add / ReLU stay f32 on the VPU (v5e-safe).
    """
    def kernel(*refs):
        x_ref, o_ref = refs[0], refs[-1]
        h = x_ref[...]                                     # already compute_dtype
        for li in range(num_layers):                       # static unroll
            w = refs[1 + 2 * li][...]
            b = refs[2 + 2 * li][...]
            acc = jnp.dot(h, w, preferred_element_type=jnp.float32) + b
            if li < num_layers - 1:
                h = jnp.maximum(acc, 0.0).astype(compute_dtype)
            else:
                o_ref[...] = acc.astype(o_ref.dtype)
    return kernel


# ----------------------------------------------------------------------------
# One-time parameter preparation (hoisted out of the forward call)
# ----------------------------------------------------------------------------
class PreparedMLPPolicy(NamedTuple):
    flat: tuple            # (W0, b0, W1, b1, ..., Wh, bh) padded jnp arrays
    n_input: int
    out_pads: tuple
    head_out_pad: int
    half_pad: int
    n_actions: int
    action_type: str
    compute_dtype: object


def prepare_mlp_policy_params(params, n_actions, action_type="discrete",
                              matmul_dtype=None):
    """Pad / fuse / cast MLP_policy params once (not per forward call).

    params: flat list [W0, b0, W1, b1, ..., head params] with W_i [in, out]
    (transposed from PyTorch) and b_i [1, out].
    matmul_dtype=jnp.bfloat16 casts MXU operands (recommended on v5e); f32 acc.
    """
    compute_dtype = jnp.float32 if matmul_dtype is None else matmul_dtype
    num_head = 2 if action_type == "discrete" else 4
    hidden, head = params[:-num_head], params[-num_head:]
    layers = [(hidden[i], hidden[i + 1]) for i in range(0, len(hidden), 2)]
    half_pad = _round_up(n_actions, LANE)
    if action_type == "discrete":
        layers.append((head[0], head[1]))
    else:
        # Fuse mean|log_var into one 2*128-wide slab -> one matmul, one store
        # (also the MXU-friendly 256-wide N on v6e/v7x).
        wm, bm, wv, bv = head
        pc = half_pad - n_actions
        layers.append((
            jnp.concatenate([jnp.pad(wm, ((0, 0), (0, pc))),
                             jnp.pad(wv, ((0, 0), (0, pc)))], axis=1),
            jnp.concatenate([jnp.pad(bm, ((0, 0), (0, pc))),
                             jnp.pad(bv, ((0, 0), (0, pc)))], axis=1)))

    n_input = int(layers[0][0].shape[0])
    flat, out_pads = [], []
    prev_out_pad = n_input            # layer 0 keeps the true (unpadded) input rows
    for w, b in layers:
        rows, cols = w.shape
        out_pad = _round_up(cols, LANE)                 # lane-dense output width
        w_p = jnp.pad(w, ((0, prev_out_pad - rows), (0, out_pad - cols)))
        b_p = jnp.pad(b, ((0, 0), (0, out_pad - cols)))
        flat += [w_p.astype(compute_dtype), b_p.astype(jnp.float32)]
        out_pads.append(out_pad)
        prev_out_pad = out_pad
    return PreparedMLPPolicy(tuple(flat), n_input, tuple(out_pads),
                             out_pads[-1], half_pad, int(n_actions),
                             action_type, compute_dtype)


# ----------------------------------------------------------------------------
# Forward
# ----------------------------------------------------------------------------
def _vmem_limit_bytes(prepped, tb, x_itemsize, out_itemsize):
    try:
        cap = int(pltpu.get_tpu_info().vmem_capacity_bytes)
    except Exception:
        cap = 64 * 1024 * 1024                         # conservative (v7x per-core)
    param_bytes = sum(int(p.size) * p.dtype.itemsize for p in prepped.flat)
    max_w = max(prepped.out_pads)
    need = (2 * param_bytes                            # resident params (<=2 bufs)
            + 2 * tb * prepped.n_input * x_itemsize    # double-buffered x tile
            + 2 * tb * prepped.head_out_pad * out_itemsize  # double-buffered out tile
            + 4 * tb * max_w * 4                       # f32 activation temps
            + (2 << 20))                               # Mosaic internal scratch slack
    return int(min(max(need, 4 << 20), cap - (8 << 20)))


def mlp_policy_forward(x, prepped: PreparedMLPPolicy):
    """Forward matching MLP_policy.forward: logits [B, n_actions] ('discrete')
    or (mean, log_var) tuple ('continuous')."""
    out_dtype = x.dtype
    batch, n_in = x.shape
    assert n_in == prepped.n_input, "feature dim mismatch"
    cd = prepped.compute_dtype
    if x.dtype != cd:
        x = x.astype(cd)            # bf16 path halves x DMA bytes; f32 acc unchanged

    # ---- batch tiling: big sublane-granular tiles, but >=2 grid steps when
    # ---- the batch allows it so both v7x TensorCores get work.
    sub = 16 if cd in (jnp.bfloat16, jnp.float16) else SUBLANE
    b_min = _round_up(batch, sub)
    if b_min <= 2 * sub:
        tb = b_min                                     # tiny batch: one tile
    else:
        tb = min(MAX_BATCH_TILE, _round_up(_cdiv(b_min, 2), sub))
    b_pad = _round_up(batch, tb)
    grid_n = b_pad // tb
    x_in = x if b_pad == batch else jnp.pad(x, ((0, b_pad - batch), (0, 0)))

    num_layers = len(prepped.out_pads)
    kernel = _make_mlp_kernel(num_layers, cd)
    vmem_limit = _vmem_limit_bytes(prepped, tb, x_in.dtype.itemsize,
                                   out_dtype.itemsize)

    def call(resident_vmem_params):
        if resident_vmem_params:
            # Whole-array VMEM residency: one DMA per parameter, single buffer
            # (no double-buffering of constant-index blocks) -> half the VMEM.
            p_specs = [pl.BlockSpec(memory_space=pltpu.MemorySpace.VMEM)
                       for _ in prepped.flat]
        else:
            # Fallback: full-array blocks with constant index maps (always lowers).
            p_specs = [pl.BlockSpec(p.shape, lambda i: (0, 0))
                       for p in prepped.flat]
        return pl.pallas_call(
            kernel,
            out_shape=jax.ShapeDtypeStruct((b_pad, prepped.head_out_pad), out_dtype),
            grid=(grid_n,),
            in_specs=[pl.BlockSpec((tb, prepped.n_input), lambda i: (i, 0))]  # x: true
                     + p_specs,                                               # feature dim
            out_specs=pl.BlockSpec((tb, prepped.head_out_pad), lambda i: (i, 0)),
            compiler_params=pltpu.CompilerParams(
                dimension_semantics=("parallel",),     # megacore sharding on v7x
                vmem_limit_bytes=vmem_limit),
        )(x_in, *prepped.flat)

    try:
        out_p = jax.block_until_ready(call(True))
    except Exception:
        out_p = call(False)

    if prepped.action_type == "discrete":
        return out_p[:batch, :prepped.n_actions]
    return (out_p[:batch, :prepped.n_actions],
            out_p[:batch, prepped.half_pad:prepped.half_pad + prepped.n_actions])


# ----------------------------------------------------------------------------
# Deterministic parameter init (PyTorch-Linear-style uniform bounds)
# ----------------------------------------------------------------------------
def init_mlp_policy_params(key, n_input, n_hiddens, n_actions, action_type):
    dims = [n_input] + list(n_hiddens)
    params = []
    for i in range(len(dims) - 1):
        fan_in, fan_out = dims[i], dims[i + 1]
        key, kw, kb = jax.random.split(key, 3)
        bound = 1.0 / jnp.sqrt(fan_in)
        params += [jax.random.uniform(kw, (fan_in, fan_out), jnp.float32, -bound, bound),
                   jax.random.uniform(kb, (1, fan_out), jnp.float32, -bound, bound)]
    fan_in = n_hiddens[-1]
    bound = 1.0 / jnp.sqrt(fan_in)
    n_heads = 1 if action_type == "discrete" else 2
    for _ in range(n_heads):
        key, kw, kb = jax.random.split(key, 3)
        params += [jax.random.uniform(kw, (fan_in, n_actions), jnp.float32, -bound, bound),
                   jax.random.uniform(kb, (1, n_actions), jnp.float32, -bound, bound)]
    return params


# ----------------------------------------------------------------------------
# Pure-JAX reference (mirrors the PyTorch forward; optional bf16-operand mode
# emulates the kernel's mixed-precision path).
# ----------------------------------------------------------------------------
def reference_forward(x, params, action_type, matmul_dtype=None):
    def mm(a, w):
        if matmul_dtype is not None:
            a = a.astype(matmul_dtype)
            w = w.astype(matmul_dtype)
        return jnp.dot(a, w, preferred_element_type=jnp.float32)

    num_head = 2 if action_type == "discrete" else 4
    hidden, head = params[:-num_head], params[-num_head:]
    h = x
    for i in range(0, len(hidden), 2):
        h = jnp.maximum(mm(h, hidden[i]) + hidden[i + 1], 0.0)
    if action_type == "discrete":
        return mm(h, head[0]) + head[1]
    return (mm(h, head[0]) + head[1], mm(h, head[2]) + head[3])


# ----------------------------------------------------------------------------
if __name__ == "__main__":
    key = jax.random.PRNGKey(0)

    # Small shapes consistent with the module: obs dim 8, hiddens [32, 32], 4 actions.
    batch, n_input, n_hiddens, n_actions = 2, 8, [32, 32], 4

    key, kx = jax.random.split(key)
    x = jax.random.normal(kx, (batch, n_input), jnp.float32)

    # --- discrete head (default path), f32 matmul ---
    key, kp = jax.random.split(key)
    params_d = init_mlp_policy_params(kp, n_input, n_hiddens, n_actions, "discrete")
    prep_d = prepare_mlp_policy_params(params_d, n_actions, "discrete")     # one-time
    logits = jax.block_until_ready(mlp_policy_forward(x, prep_d))
    ref_logits = reference_forward(x, params_d, "discrete")
    assert jnp.allclose(logits, ref_logits, atol=1e-4, rtol=1e-4)

    # --- continuous head: (mean, log_var) fused into one 256-wide matmul ---
    key, kp2 = jax.random.split(key)
    params_c = init_mlp_policy_params(kp2, n_input, n_hiddens, n_actions, "continuous")
    prep_c = prepare_mlp_policy_params(params_c, n_actions, "continuous")
    mean, log_var = mlp_policy_forward(x, prep_c)
    jax.block_until_ready((mean, log_var))
    ref_mean, ref_log_var = reference_forward(x, params_c, "continuous")
    assert jnp.allclose(mean, ref_mean, atol=1e-4, rtol=1e-4)
    assert jnp.allclose(log_var, ref_log_var, atol=1e-4, rtol=1e-4)

    # --- bf16 MXU operands (recommended default on v5e), f32 accumulation ---
    prep_d_bf16 = prepare_mlp_policy_params(params_d, n_actions, "discrete",
                                            matmul_dtype=jnp.bfloat16)
    logits_bf16 = jax.block_until_ready(mlp_policy_forward(x, prep_d_bf16))
    ref_bf16 = reference_forward(x, params_d, "discrete", matmul_dtype=jnp.bfloat16)
    assert jnp.allclose(logits_bf16, ref_bf16, atol=2e-2, rtol=2e-2)

    # --- batch-tiled path: >=2 grid steps, params prepared once and reused ---
    key, kxb = jax.random.split(key)
    xb = jax.random.normal(kxb, (300, n_input), jnp.float32)
    logits_b = jax.block_until_ready(mlp_policy_forward(xb, prep_d))
    ref_b = reference_forward(xb, params_d, "discrete")
    assert jnp.allclose(logits_b, ref_b, atol=1e-4, rtol=1e-4)

    # TODO(synk): sample_action / entropy use torch.distributions sampling
    # (multinomial / MultivariateNormal); only the deterministic forward pass
    # is implemented as a kernel.
    print("KERNEL_OK")
</pallas_src>

<mosaic_0001>
module attributes {stable_mosaic.version = 11 : i64} {
  func.func @kernel(%arg0: i32, %arg1: memref<8x8xf32, #tpu.memory_space<vmem>>, %arg2: memref<8x128xf32, #tpu.memory_space<vmem>>, %arg3: memref<1x128xf32, #tpu.memory_space<vmem>>, %arg4: memref<128x128xf32, #tpu.memory_space<vmem>>, %arg5: memref<1x128xf32, #tpu.memory_space<vmem>>, %arg6: memref<128x128xf32, #tpu.memory_space<vmem>>, %arg7: memref<1x128xf32, #tpu.memory_space<vmem>>, %arg8: memref<8x128xf32, #tpu.memory_space<vmem>>) attributes {dimension_semantics = [#tpu.dimension_semantics<parallel>], iteration_bounds = array<i64: 1>, scalar_prefetch = 0 : i64, scratch_operands = 0 : i64, tpu.core_type = #tpu.core_type<tc>, window_params = [{transform_indices = @transform_0, window_bounds = array<i64: 8, 8>}, {pipeline_mode = #tpu.pipeline_mode<synchronous>, transform_indices = @transform_1, window_bounds = array<i64: 8, 128>}, {pipeline_mode = #tpu.pipeline_mode<synchronous>, transform_indices = @transform_2, window_bounds = array<i64: 1, 128>}, {pipeline_mode = #tpu.pipeline_mode<synchronous>, transform_indices = @transform_3, window_bounds = array<i64: 128, 128>}, {pipeline_mode = #tpu.pipeline_mode<synchronous>, transform_indices = @transform_4, window_bounds = array<i64: 1, 128>}, {pipeline_mode = #tpu.pipeline_mode<synchronous>, transform_indices = @transform_5, window_bounds = array<i64: 128, 128>}, {pipeline_mode = #tpu.pipeline_mode<synchronous>, transform_indices = @transform_6, window_bounds = array<i64: 1, 128>}, {transform_indices = @transform_7, window_bounds = array<i64: 8, 128>}]} {
    %c0 = arith.constant 0 : index
    %c0_0 = arith.constant 0 : index
    %0 = vector.load %arg1[%c0, %c0_0] : memref<8x8xf32, #tpu.memory_space<vmem>>, vector<8x8xf32>
    %c0_1 = arith.constant 0 : index
    %c0_2 = arith.constant 0 : index
    %1 = vector.load %arg2[%c0_1, %c0_2] : memref<8x128xf32, #tpu.memory_space<vmem>>, vector<8x128xf32>
    %c0_3 = arith.constant 0 : index
    %c0_4 = arith.constant 0 : index
    %2 = vector.load %arg3[%c0_3, %c0_4] : memref<1x128xf32, #tpu.memory_space<vmem>>, vector<1x128xf32>
    %cst = arith.constant dense<0.000000e+00> : vector<8x128xf32>
    %3 = tpu.matmul %0, %1, %cst {dimension_numbers = #tpu.dot_dimension_numbers<[1], [0], [0], [1], [0, 0, 1, 1], [], []>} : vector<8x8xf32>, vector<8x128xf32>, vector<8x128xf32> -> vector<8x128xf32>
    %4 = vector.broadcast %2 : vector<1x128xf32> to vector<8x128xf32>
    %5 = arith.addf %3, %4 : vector<8x128xf32>
    %cst_5 = arith.constant 0.000000e+00 : f32
    %6 = vector.broadcast %cst_5 : f32 to vector<8x128xf32>
    %7 = arith.maximumf %5, %6 : vector<8x128xf32>
    %c0_6 = arith.constant 0 : index
    %c0_7 = arith.constant 0 : index
    %8 = vector.load %arg4[%c0_6, %c0_7] : memref<128x128xf32, #tpu.memory_space<vmem>>, vector<128x128xf32>
    %c0_8 = arith.constant 0 : index
    %c0_9 = arith.constant 0 : index
    %9 = vector.load %arg5[%c0_8, %c0_9] : memref<1x128xf32, #tpu.memory_space<vmem>>, vector<1x128xf32>
    %cst_10 = arith.constant dense<0.000000e+00> : vector<8x128xf32>
    %10 = tpu.matmul %7, %8, %cst_10 {dimension_numbers = #tpu.dot_dimension_numbers<[1], [0], [0], [1], [0, 0, 1, 1], [], []>} : vector<8x128xf32>, vector<128x128xf32>, vector<8x128xf32> -> vector<8x128xf32>
    %11 = vector.broadcast %9 : vector<1x128xf32> to vector<8x128xf32>
    %12 = arith.addf %10, %11 : vector<8x128xf32>
    %cst_11 = arith.constant 0.000000e+00 : f32
    %13 = vector.broadcast %cst_11 : f32 to vector<8x128xf32>
    %14 = arith.maximumf %12, %13 : vector<8x128xf32>
    %c0_12 = arith.constant 0 : index
    %c0_13 = arith.constant 0 : index
    %15 = vector.load %arg6[%c0_12, %c0_13] : memref<128x128xf32, #tpu.memory_space<vmem>>, vector<128x128xf32>
    %c0_14 = arith.constant 0 : index
    %c0_15 = arith.constant 0 : index
    %16 = vector.load %arg7[%c0_14, %c0_15] : memref<1x128xf32, #tpu.memory_space<vmem>>, vector<1x128xf32>
    %cst_16 = arith.constant dense<0.000000e+00> : vector<8x128xf32>
    %17 = tpu.matmul %14, %15, %cst_16 {dimension_numbers = #tpu.dot_dimension_numbers<[1], [0], [0], [1], [0, 0, 1, 1], [], []>} : vector<8x128xf32>, vector<128x128xf32>, vector<8x128xf32> -> vector<8x128xf32>
    %18 = vector.broadcast %16 : vector<1x128xf32> to vector<8x128xf32>
    %19 = arith.addf %17, %18 : vector<8x128xf32>
    %c0_17 = arith.constant 0 : index
    %c0_18 = arith.constant 0 : index
    %20 = vector.load %arg8[%c0_17, %c0_18] : memref<8x128xf32, #tpu.memory_space<vmem>>, vector<8x128xf32>
    tpu.vector_store %arg8[%c0_17, %c0_18], %19 {strides = array<i32>} : memref<8x128xf32, #tpu.memory_space<vmem>>, vector<8x128xf32>,
    return
  }
  func.func @transform_0(%arg0: i32) -> (i32, i32) {
    %c0_i32 = arith.constant 0 : i32
    %c0_i32_0 = arith.constant 0 : i32
    return %arg0, %c0_i32 : i32, i32
  }
  func.func @transform_1(%arg0: i32) -> (i32, i32) {
    %c0_i32 = arith.constant 0 : i32
    %c0_i32_0 = arith.constant 0 : i32
    %c0_i32_1 = arith.constant 0 : i32
    return %c0_i32, %c0_i32_0 : i32, i32
  }
  func.func @transform_2(%arg0: i32) -> (i32, i32) {
    %c0_i32 = arith.constant 0 : i32
    %c0_i32_0 = arith.constant 0 : i32
    %c0_i32_1 = arith.constant 0 : i32
    return %c0_i32, %c0_i32_0 : i32, i32
  }
  func.func @transform_3(%arg0: i32) -> (i32, i32) {
    %c0_i32 = arith.constant 0 : i32
    %c0_i32_0 = arith.constant 0 : i32
    %c0_i32_1 = arith.constant 0 : i32
    return %c0_i32, %c0_i32_0 : i32, i32
  }
  func.func @transform_4(%arg0: i32) -> (i32, i32) {
    %c0_i32 = arith.constant 0 : i32
    %c0_i32_0 = arith.constant 0 : i32
    %c0_i32_1 = arith.constant 0 : i32
    return %c0_i32, %c0_i32_0 : i32, i32
  }
  func.func @transform_5(%arg0: i32) -> (i32, i32) {
    %c0_i32 = arith.constant 0 : i32
    %c0_i32_0 = arith.constant 0 : i32
    %c0_i32_1 = arith.constant 0 : i32
    return %c0_i32, %c0_i32_0 : i32, i32
  }
  func.func @transform_6(%arg0: i32) -> (i32, i32) {
    %c0_i32 = arith.constant 0 : i32
    %c0_i32_0 = arith.constant 0 : i32
    %c0_i32_1 = arith.constant 0 : i32
    return %c0_i32, %c0_i32_0 : i32, i32
  }
  func.func @transform_7(%arg0: i32) -> (i32, i32) {
    %c0_i32 = arith.constant 0 : i32
    %c0_i32_0 = arith.constant 0 : i32
    return %arg0, %c0_i32 : i32, i32
  }
}

module attributes {stable_mosaic.version = 11 : i64} {
  func.func @kernel(%arg0: i32, %arg1: memref<8x8xf32, #tpu.memory_space<vmem>>, %arg2: memref<8x128xf32, #tpu.memory_space<vmem>>, %arg3: memref<1x128xf32, #tpu.memory_space<vmem>>, %arg4: memref<128x128xf32, #tpu.memory_space<vmem>>, %arg5: memref<1x128xf32, #tpu.memory_space<vmem>>, %arg6: memref<128x128xf32, #tpu.memory_space<vmem>>, %arg7: memref<1x128xf32, #tpu.memory_space<vmem>>, %arg8: memref<8x128xf32, #tpu.memory_space<vmem>>) attributes {dimension_semantics = [#tpu.dimension_semantics<parallel>], iteration_bounds = array<i64: 1>, scalar_prefetch = 0 : i64, scratch_operands = 0 : i64, tpu.core_type = #tpu.core_type<tc>, window_params = [{transform_indices = @transform_0, window_bounds = array<i64: 8, 8>}, {pipeline_mode = #tpu.pipeline_mode<synchronous>, transform_indices = @transform_1, window_bounds = array<i64: 8, 128>}, {pipeline_mode = #tpu.pipeline_mode<synchronous>, transform_indices = @transform_2, window_bounds = array<i64: 1, 128>}, {pipeline_mode = #tpu.pipeline_mode<synchronous>, transform_indices = @transform_3, window_bounds = array<i64: 128, 128>}, {pipeline_mode = #tpu.pipeline_mode<synchronous>, transform_indices = @transform_4, window_bounds = array<i64: 1, 128>}, {pipeline_mode = #tpu.pipeline_mode<synchronous>, transform_indices = @transform_5, window_bounds = array<i64: 128, 128>}, {pipeline_mode = #tpu.pipeline_mode<synchronous>, transform_indices = @transform_6, window_bounds = array<i64: 1, 128>}, {transform_indices = @transform_7, window_bounds = array<i64: 8, 128>}]} {
    %c0 = arith.constant 0 : index
    %c0_0 = arith.constant 0 : index
    %0 = vector.load %arg1[%c0, %c0_0] : memref<8x8xf32, #tpu.memory_space<vmem>>, vector<8x8xf32>
    %c0_1 = arith.constant 0 : index
    %c0_2 = arith.constant 0 : index
    %1 = vector.load %arg2[%c0_1, %c0_2] : memref<8x128xf32, #tpu.memory_space<vmem>>, vector<8x128xf32>
    %c0_3 = arith.constant 0 : index
    %c0_4 = arith.constant 0 : index
    %2 = vector.load %arg3[%c0_3, %c0_4] : memref<1x128xf32, #tpu.memory_space<vmem>>, vector<1x128xf32>
    %cst = arith.constant dense<0.000000e+00> : vector<8x128xf32>
    %3 = tpu.matmul %0, %1, %cst {dimension_numbers = #tpu.dot_dimension_numbers<[1], [0], [0], [1], [0, 0, 1, 1], [], []>} : vector<8x8xf32>, vector<8x128xf32>, vector<8x128xf32> -> vector<8x128xf32>
    %4 = vector.broadcast %2 : vector<1x128xf32> to vector<8x128xf32>
    %5 = arith.addf %3, %4 : vector<8x128xf32>
    %cst_5 = arith.constant 0.000000e+00 : f32
    %6 = vector.broadcast %cst_5 : f32 to vector<8x128xf32>
    %7 = arith.maximumf %5, %6 : vector<8x128xf32>
    %c0_6 = arith.constant 0 : index
    %c0_7 = arith.constant 0 : index
    %8 = vector.load %arg4[%c0_6, %c0_7] : memref<128x128xf32, #tpu.memory_space<vmem>>, vector<128x128xf32>
    %c0_8 = arith.constant 0 : index
    %c0_9 = arith.constant 0 : index
    %9 = vector.load %arg5[%c0_8, %c0_9] : memref<1x128xf32, #tpu.memory_space<vmem>>, vector<1x128xf32>
    %cst_10 = arith.constant dense<0.000000e+00> : vector<8x128xf32>
    %10 = tpu.matmul %7, %8, %cst_10 {dimension_numbers = #tpu.dot_dimension_numbers<[1], [0], [0], [1], [0, 0, 1, 1], [], []>} : vector<8x128xf32>, vector<128x128xf32>, vector<8x128xf32> -> vector<8x128xf32>
    %11 = vector.broadcast %9 : vector<1x128xf32> to vector<8x128xf32>
    %12 = arith.addf %10, %11 : vector<8x128xf32>
    %cst_11 = arith.constant 0.000000e+00 : f32
    %13 = vector.broadcast %cst_11 : f32 to vector<8x128xf32>
    %14 = arith.maximumf %12, %13 : vector<8x128xf32>
    %c0_12 = arith.constant 0 : index
    %c0_13 = arith.constant 0 : index
    %15 = vector.load %arg6[%c0_12, %c0_13] : memref<128x128xf32, #tpu.memory_space<vmem>>, vector<128x128xf32>
    %c0_14 = arith.constant 0 : index
    %c0_15 = arith.constant 0 : index
    %16 = vector.load %arg7[%c0_14, %c0_15] : memref<1x128xf32, #tpu.memory_space<vmem>>, vector<1x128xf32>
    %cst_16 = arith.constant dense<0.000000e+00> : vector<8x128xf32>
    %17 = tpu.matmul %14, %15, %cst_16 {dimension_numbers = #tpu.dot_dimension_numbers<[1], [0], [0], [1], [0, 0, 1, 1], [], []>} : vector<8x128xf32>, vector<128x128xf32>, vector<8x128xf32> -> vector<8x128xf32>
    %18 = vector.broadcast %16 : vector<1x128xf32> to vector<8x128xf32>
    %19 = arith.addf %17, %18 : vector<8x128xf32>
    %c0_17 = arith.constant 0 : index
    %c0_18 = arith.constant 0 : index
    %20 = vector.load %arg8[%c0_17, %c0_18] : memref<8x128xf32, #tpu.memory_space<vmem>>, vector<8x128xf32>
    tpu.vector_store %arg8[%c0_17, %c0_18], %19 {strides = array<i32>} : memref<8x128xf32, #tpu.memory_space<vmem>>, vector<8x128xf32>,
    return
  }
  func.func @transform_0(%arg0: i32) -> (i32, i32) {
    %c0_i32 = arith.constant 0 : i32
    %c0_i32_0 = arith.constant 0 : i32
    return %arg0, %c0_i32 : i32, i32
  }
  func.func @transform_1(%arg0: i32) -> (i32, i32) {
    %c0_i32 = arith.constant 0 : i32
    %c0_i32_0 = arith.constant 0 : i32
    %c0_i32_1 = arith.constant 0 : i32
    return %c0_i32, %c0_i32_0 : i32, i32
  }
  func.func @transform_2(%arg0: i32) -> (i32, i32) {
    %c0_i32 = arith.constant 0 : i32
    %c0_i32_0 = arith.constant 0 : i32
    %c0_i32_1 = arith.constant 0 : i32
    return %c0_i32, %c0_i32_0 : i32, i32
  }
  func.func @transform_3(%arg0: i32) -> (i32, i32) {
    %c0_i32 = arith.constant 0 : i32
    %c0_i32_0 = arith.constant 0 : i32
    %c0_i32_1 = arith.constant 0 : i32
    return %c0_i32, %c0_i32_0 : i32, i32
  }
  func.func @transform_4(%arg0: i32) -> (i32, i32) {
    %c0_i32 = arith.constant 0 : i32
    %c0_i32_0 = arith.constant 0 : i32
    %c0_i32_1 = arith.constant 0 : i32
    return %c0_i32, %c0_i32_0 : i32, i32
  }
  func.func @transform_5(%arg0: i32) -> (i32, i32) {
    %c0_i32 = arith.constant 0 : i32
    %c0_i32_0 = arith.constant 0 : i32
    %c0_i32_1 = arith.constant 0 : i32
    return %c0_i32, %c0_i32_0 : i32, i32
  }
  func.func @transform_6(%arg0: i32) -> (i32, i32) {
    %c0_i32 = arith.constant 0 : i32
    %c0_i32_0 = arith.constant 0 : i32
    %c0_i32_1 = arith.constant 0 : i32
    return %c0_i32, %c0_i32_0 : i32, i32
  }
  func.func @transform_7(%arg0: i32) -> (i32, i32) {
    %c0_i32 = arith.constant 0 : i32
    %c0_i32_0 = arith.constant 0 : i32
    return %arg0, %c0_i32 : i32, i32
  }
}

</mosaic_0001>

<bundles_post_ra>
// kernel: tpu_custom_call.1
= control target key start
LH: loop header
LB: loop body
LE: loop exit
PB: predicated region body
PF: predicated region fallthrough
CT: control target
= control target key end

     0   :  { %12 = vsyncpa [#allocation3], 0  ;;  %s711_s0 = inlined_call_operand.hbm [shape: f32[8,8], index: 0, kind: input, shape index: {}]   ;;  %s712_s1 = inlined_call_operand.hbm [shape: f32[8,128], index: 1, kind: input, shape index: {}]   ;;  %s713_s2 = inlined_call_operand.vmem [shape: f32[1,128], index: 2, kind: input, shape index: {}]   ;;  %s714_s3 = inlined_call_operand.hbm [shape: f32[128,128], index: 3, kind: input, shape index: {}]   ;;  %s715_s4 = inlined_call_operand.vmem [shape: f32[1,128], index: 4, kind: input, shape index: {}]   ;;  %s716_s5 = inlined_call_operand.hbm [shape: f32[128,128], index: 5, kind: input, shape index: {}]   ;;  %s717_s6 = inlined_call_operand.vmem [shape: f32[1,128], index: 6, kind: input, shape index: {}]   ;;  %s718_s7 = inlined_call_operand.hbm [shape: f32[8,128], index: 7, kind: output, shape index: {}]  }
   0x1   :  { %13 = vsyncpa [#allocation6], 0 }
   0x2   :  { %14 = vsyncpa [#allocation9], 0 }
   0x3   :  { %15 = vsyncpa [#allocation4], 0  ;;  %s599_s24 = smov [#allocation5]   ;;  %s600_s26 = smov [#allocation2]  }
   0x4   :  { %s32_s25 = sshll.u32 %s599_s24, 4  ;;  %s22_s27 = sshll.u32 %s600_s26, 4  ;;  %s33_s25 = int_to_ptr.vmem [resolvable:$true] %s32_s25  ;;  %s23_s27 = int_to_ptr.vmem [resolvable:$true] %s22_s27 }
   0x5   :  { %s499_s28 = scalar_lea.vmem %s33_s25, 128  ;;  %p504_p1 = scmp.lt.s32.totalorder %s33_s25, %s33_s25 }
   0x6   :  { %p500_p0 = scmp.ne.s32.totalorder %s33_s25, %s499_s28  ;;  %p505_p2 = scmp.lt.s32.totalorder %s499_s28, %s499_s28 }
   0x8   :  { %p506_p3 = por %p505_p2, %p504_p1 }
   0xa   :  { %p507_p4 = pnand %p506_p3, %p500_p0 }
   0xc   :  { %510 = shalt.err (!%p507_p4)
}
   0xd   :  { %35 = dma.hbm_to_vmem [thread:$0]  %s712_s1, 128, %s33_s25, [#allocation6]  }
   0xe   :  { %s519_s8 = scalar_lea.vmem %s23_s27, 128  ;;  %p524_p6 = scmp.lt.s32.totalorder %s23_s27, %s23_s27 }
   0xf   :  { %p520_p5 = scmp.ne.s32.totalorder %s23_s27, %s519_s8  ;;  %p525_p7 = scmp.lt.s32.totalorder %s519_s8, %s519_s8 }
  0x11   :  { %p526_p8 = por %p525_p7, %p524_p6 }
  0x13   :  { %p527_p9 = pnand %p526_p8, %p520_p5 }
  0x15   :  { %530 = shalt.err (!%p527_p9)
}
  0x16   :  { %25 = dma.hbm_to_vmem [thread:$0]  %s711_s0, 128, %s23_s27, [#allocation3]  }
  0x17   :  { %s601_s11 = smov [#allocation7]  }
  0x18   :  { %s43_s12 = sshll.u32 %s601_s11, 4  ;;  %s44_s12 = int_to_ptr.vmem [resolvable:$true] %s43_s12 }
  0x19   :  { %s539_s13 = scalar_lea.vmem %s44_s12, 2048  ;;  %p544_p11 = scmp.lt.s32.totalorder %s44_s12, %s44_s12 }
  0x1a   :  { %p540_p10 = scmp.ne.s32.totalorder %s44_s12, %s539_s13  ;;  %p545_p12 = scmp.lt.s32.totalorder %s539_s13, %s539_s13 }
  0x1c   :  { %p546_p13 = por %p545_p12, %p544_p11 }
  0x1e   :  { %p547_p0 = pnand %p546_p13, %p540_p10 }
  0x20   :  { %550 = shalt.err (!%p547_p0)
}
  0x21   :  { %s602_s1 = smov 128   ;;  %s603_s14 = smov 8  }
  0x22   :  { %49 = dma.hbm_to_vmem [thread:$0]  %s714_s3, 2048, %s44_s12, [#allocation6], %s602_s1, %s602_s1, %s603_s14  }
  0x23   :  { %s604_s17 = smov [#allocation8]  }
  0x24   :  { %s57_s18 = sshll.u32 %s604_s17, 4  ;;  %s58_s18 = int_to_ptr.vmem [resolvable:$true] %s57_s18 }
  0x25   :  { %s559_s0 = scalar_lea.vmem %s58_s18, 2048  ;;  %p564_p2 = scmp.lt.s32.totalorder %s58_s18, %s58_s18 }
  0x26   :  { %p560_p1 = scmp.ne.s32.totalorder %s58_s18, %s559_s0  ;;  %p565_p3 = scmp.lt.s32.totalorder %s559_s0, %s559_s0 }
  0x28   :  { %p566_p4 = por %p565_p3, %p564_p2 }
  0x2a   :  { %p567_p5 = pnand %p566_p4, %p560_p1 }
  0x2c   :  { %570 = shalt.err (!%p567_p5)
}
  0x2d   :  { %63 = dma.hbm_to_vmem [thread:$0]  %s716_s5, 2048, %s58_s18, [#allocation9], %s602_s1, %s602_s1, %s603_s14  }
  0x2e   :  { %591 = dma.done.wait [#allocation3], 128  }
  0x2f   :  { %592 = vsyncadd [#allocation3], 4294967168 }
  0x30   :  { %593 = dma.done.wait [#allocation6], 2176  }
  0x31   :  { %594 = vsyncadd [#allocation6], 4294965120 }
  0x32   :  { %595 = dma.done.wait [#allocation9], 2048  }
  0x33   :  { %596 = vsyncadd [#allocation9], 4294965248  ;;  %v605_v0 = vmov 0.0   ;;  %vm606_vm0 = vmmov 0   ;;  %vm87_vm1 = vcmask 64512   ;;  %v79_v1 = vld [vmem:[#allocation5] sm:$0xff] }
  0x34   :  { %407 = vmatprep.subr.mxu0 %v605_v0  ;;  %409 = vmatprep.mubr.msk.f32.mxu0 %vm606_vm0, %v605_v0  ;;  %v78_v2 = vld [vmem:[#allocation2] sm:$0xff]  ;;  %v177_v3 = vld [vmem:[#allocation7 + $0x78] sm:$0xff]  ;;  %v175_v5 = vld [vmem:[#allocation7 + $0x68] sm:$0xff]  ;;  %s607_s24 = smov [#allocation10]  }
  0x35   :  { %412 = vmatprep.subr.mxu1 %v605_v0  ;;  %444 = vmatprep.mubr.msk.f32.mxu1 %vm606_vm0, %v605_v0  ;;  %v176_v4 = vld [vmem:[#allocation7 + $0x70] sm:$0xff]  ;;  %v174_v6 = vld [vmem:[#allocation7 + $0x60] sm:$0xff]  ;;  %v173_v7 = vld [vmem:[#allocation7 + $0x58] sm:$0xff]  ;;  %s356_s25 = sshll.u32 %s607_s24, 4  ;;  %s357_s25 = int_to_ptr.vmem [resolvable:$true] %s356_s25 }
  0x36   :  { %408 = vmatpush3.msra.mxu0 %v79_v1  ;;  %413 = vmatpush3.msra.mxu1 %v177_v3  ;;  %v172_v8 = vld [vmem:[#allocation7 + $0x50] sm:$0xff]  ;;  %v171_v9 = vld [vmem:[#allocation7 + $0x48] sm:$0xff]  ;;  %v170_v10 = vld [vmem:[#allocation7 + $0x40] sm:$0xff]  ;;  %s571_s26 = scalar_lea.vmem %s357_s25, 128  ;;  %p576_p7 = scmp.lt.s32.totalorder %s357_s25, %s357_s25 }
  0x37   :  { %410 = vmatmul.mubr.msk.f32.vlgmr.msra.gmra.mxu0 %vm87_vm1, %v78_v2  ;;  %414 = vmatprep.subr.mxu1 %v605_v0  ;;  %v169_v11 = vld [vmem:[#allocation7 + $0x38] sm:$0xff]  ;;  %v168_v12 = vld [vmem:[#allocation7 + $0x30] sm:$0xff]  ;;  %v167_v13 = vld [vmem:[#allocation7 + $0x28] sm:$0xff]  ;;  %p572_p6 = scmp.ne.s32.totalorder %s357_s25, %s571_s26  ;;  %p577_p8 = scmp.lt.s32.totalorder %s571_s26, %s571_s26 }
  0x38   :  { %415 = vmatpush3.msra.mxu1 %v176_v4  ;;  %447 = vmatprep.subr.mxu0 %v605_v0  ;;  %v166_v14 = vld [vmem:[#allocation7 + $0x20] sm:$0xff]  ;;  %v165_v15 = vld [vmem:[#allocation7 + $0x18] sm:$0xff]  ;;  %v164_v16 = vld [vmem:[#allocation7 + $0x10] sm:$0xff] }
  0x39   :  { %416 = vmatprep.subr.mxu1 %v605_v0  ;;  %479 = vmatprep.mubr.msk.f32.mxu0 %vm606_vm0, %v605_v0  ;;  %v163_v17 = vld [vmem:[#allocation7 + $0x8] sm:$0xff]  ;;  %v162_v18 = vld [vmem:[#allocation7] sm:$0xff]  ;;  %v271_v19 = vld [vmem:[#allocation8 + $0x78] sm:$0xff]  ;;  %p578_p9 = por %p577_p8, %p576_p7 }
  0x3a   :  { %417 = vmatpush3.msra.mxu1 %v175_v5  ;;  %v270_v20 = vld [vmem:[#allocation8 + $0x70] sm:$0xff]  ;;  %448 = vmatpush3.msra.mxu0 %v271_v19  ;;  %v269_v21 = vld [vmem:[#allocation8 + $0x68] sm:$0xff]  ;;  %v268_v22 = vld [vmem:[#allocation8 + $0x60] sm:$0xff] }
  0x3b   :  { %418 = vmatprep.subr.mxu1 %v605_v0  ;;  %449 = vmatprep.subr.mxu0 %v605_v0  ;;  %v267_v23 = vld [vmem:[#allocation8 + $0x58] sm:$0xff]  ;;  %v266_v24 = vld [vmem:[#allocation8 + $0x50] sm:$0xff]  ;;  %v265_v25 = vld [vmem:[#allocation8 + $0x48] sm:$0xff]  ;;  %p579_p10 = pnand %p578_p9, %p572_p6 }
  0x3c   :  { %419 = vmatpush3.msra.mxu1 %v174_v6  ;;  %450 = vmatpush3.msra.mxu0 %v270_v20  ;;  %v264_v26 = vld [vmem:[#allocation8 + $0x40] sm:$0xff]  ;;  %v263_v27 = vld [vmem:[#allocation8 + $0x38] sm:$0xff]  ;;  %v262_v28 = vld [vmem:[#allocation8 + $0x30] sm:$0xff] }
  0x3d   :  { %420 = vmatprep.subr.mxu1 %v605_v0  ;;  %451 = vmatprep.subr.mxu0 %v605_v0  ;;  %v261_v29 = vld [vmem:[#allocation8 + $0x28] sm:$0xff]  ;;  %v260_v30 = vld [vmem:[#allocation8 + $0x20] sm:$0xff]  ;;  %v259_v31 = vld [vmem:[#allocation8 + $0x18] sm:$0xff] }
  0x3e   :  { %421 = vmatpush3.msra.mxu1 %v173_v7  ;;  %452 = vmatpush3.msra.mxu0 %v269_v21  ;;  %v367_v32 = vld [vmem:[%s713_s2] ss:$0 sm:$0xff]  ;;  %v257_v38 = vld [vmem:[#allocation8 + $0x8] sm:$0xff]  ;;  %v256_v39 = vld [vmem:[#allocation8] sm:$0xff] }
  0x3f   :  { %422 = vmatprep.subr.mxu1 %v605_v0  ;;  %453 = vmatprep.subr.mxu0 %v605_v0  ;;  %v258_v37 = vld [vmem:[#allocation8 + $0x10] sm:$0xff] }
  0x40   :  { %423 = vmatpush3.msra.mxu1 %v172_v8  ;;  %454 = vmatpush3.msra.mxu0 %v268_v22  ;;  %v369_v40 = vld [vmem:[%s715_s4] ss:$0 sm:$0xff] }
  0x41   :  { %424 = vmatprep.subr.mxu1 %v605_v0  ;;  %455 = vmatprep.subr.mxu0 %v605_v0  ;;  %v370_v45 = vld [vmem:[%s717_s6] ss:$0 sm:$0xff] }
  0x42   :  { %425 = vmatpush3.msra.mxu1 %v171_v9  ;;  %456 = vmatpush3.msra.mxu0 %v267_v23 }
  0x43   :  { %426 = vmatprep.subr.mxu1 %v605_v0  ;;  %457 = vmatprep.subr.mxu0 %v605_v0 }
  0x44   :  { %427 = vmatpush3.msra.mxu1 %v170_v10  ;;  %458 = vmatpush3.msra.mxu0 %v266_v24 }
  0x45   :  { %428 = vmatprep.subr.mxu1 %v605_v0  ;;  %459 = vmatprep.subr.mxu0 %v605_v0 }
  0x46   :  { %429 = vmatpush3.msra.mxu1 %v169_v11  ;;  %460 = vmatpush3.msra.mxu0 %v265_v25 }
  0x47   :  { %430 = vmatprep.subr.mxu1 %v605_v0  ;;  %461 = vmatprep.subr.mxu0 %v605_v0 }
  0x48   :  { %431 = vmatpush3.msra.mxu1 %v168_v12  ;;  %462 = vmatpush3.msra.mxu0 %v264_v26 }
  0x49   :  { %432 = vmatprep.subr.mxu1 %v605_v0  ;;  %463 = vmatprep.subr.mxu0 %v605_v0 }
  0x4a   :  { %433 = vmatpush3.msra.mxu1 %v167_v13  ;;  %464 = vmatpush3.msra.mxu0 %v263_v27 }
  0x4b   :  { %434 = vmatprep.subr.mxu1 %v605_v0  ;;  %465 = vmatprep.subr.mxu0 %v605_v0 }
  0x4c   :  { %435 = vmatpush3.msra.mxu1 %v166_v14  ;;  %466 = vmatpush3.msra.mxu0 %v262_v28 }
  0x4d   :  { %436 = vmatprep.subr.mxu1 %v605_v0  ;;  %467 = vmatprep.subr.mxu0 %v605_v0 }
  0x4e   :  { %437 = vmatpush3.msra.mxu1 %v165_v15  ;;  %468 = vmatpush3.msra.mxu0 %v261_v29 }
  0x4f   :  { %438 = vmatprep.subr.mxu1 %v605_v0  ;;  %469 = vmatprep.subr.mxu0 %v605_v0 }
  0x50   :  { %439 = vmatpush3.msra.mxu1 %v164_v16  ;;  %470 = vmatpush3.msra.mxu0 %v260_v30 }
  0x51   :  { %440 = vmatprep.subr.mxu1 %v605_v0  ;;  %471 = vmatprep.subr.mxu0 %v605_v0 }
  0x52   :  { %441 = vmatpush3.msra.mxu1 %v163_v17  ;;  %472 = vmatpush3.msra.mxu0 %v259_v31 }
  0x53   :  { %442 = vmatprep.subr.mxu1 %v605_v0  ;;  %473 = vmatprep.subr.mxu0 %v605_v0 }
  0x54   :  { %443 = vmatpush3.msra.mxu1 %v162_v18  ;;  %474 = vmatpush3.msra.mxu0 %v258_v37 }
  0x55   :  { %475 = vmatprep.subr.mxu0 %v605_v0 }
  0x56   :  { %476 = vmatpush3.msra.mxu0 %v257_v38 }
  0x57   :  { %477 = vmatprep.subr.mxu0 %v605_v0 }
  0x58   :  { %478 = vmatpush3.msra.mxu0 %v256_v39 }
  0xf7   :  { %v157_v33 = vpop.f32.mrf.mxu0 }
  0xf8   :  { %v158_v34 = vadd.f32 %v367_v32, %v157_v33 }
  0xf9   :  { %v411_v35 = vpop.f32.mrf.mxu0 }
  0xfa   :  { %v161_v36 = vmax.f32 %v158_v34, 0.0 }
  0xfc   :  { %445 = vmatmul.mubr.f32.vlgmr.msra.gmra.mxu1 %v161_v36 }
 0x1bc   :  { %v251_v41 = vpop.f32.mrf.mxu1 }
 0x1bd   :  { %v252_v42 = vadd.f32 %v369_v40, %v251_v41 }
 0x1be   :  { %v446_v43 = vpop.f32.mrf.mxu1 }
 0x1bf   :  { %v255_v44 = vmax.f32 %v252_v42, 0.0 }
 0x1c1   :  { %480 = vmatmul.mubr.f32.vlgmr.msra.gmra.mxu0 %v255_v44 }
 0x281   :  { %v345_v46 = vpop.f32.mrf.mxu0 }
 0x282   :  { %v346_v47 = vadd.f32 %v370_v45, %v345_v46 }
 0x283   :  { %v481_v48 = vpop.f32.mrf.mxu0 }
 0x284   :  { %349 = vst [vmem:[#allocation10] sm:$0xff] %v346_v47 }
 0x285   :  { %582 = shalt.err (!%p579_p10)
}
 0x286   :  { %359 = dma.vmem_to_hbm [thread:$0]  %s357_s25, 128, %s718_s7, [#allocation4]  }
 0x287   :  { %597 = dma.done.wait [#allocation4], 128  }
 0x288   :  { %598 = vsyncadd [#allocation4], 4294967168 }
 0x289   :  { %363 = vsyncpa [#allocation3], 1 }
 0x28a   :  { %364 = vsyncpa [#allocation6], 1 }
 0x28b   :  { %365 = vsyncpa [#allocation9], 1 }
 0x28c   :  { %366 = vsyncpa [#allocation4], 1 }

// kernel: tpu_custom_call.1
= control target key start
LH: loop header
LB: loop body
LE: loop exit
PB: predicated region body
PF: predicated region fallthrough
CT: control target
= control target key end

     0   :  { %12 = vsyncpa [#allocation3], 0  ;;  %s711_s0 = inlined_call_operand.hbm [shape: f32[8,8], index: 0, kind: input, shape index: {}]   ;;  %s712_s1 = inlined_call_operand.hbm [shape: f32[8,128], index: 1, kind: input, shape index: {}]   ;;  %s713_s2 = inlined_call_operand.vmem [shape: f32[1,128], index: 2, kind: input, shape index: {}]   ;;  %s714_s3 = inlined_call_operand.hbm [shape: f32[128,128], index: 3, kind: input, shape index: {}]   ;;  %s715_s4 = inlined_call_operand.vmem [shape: f32[1,128], index: 4, kind: input, shape index: {}]   ;;  %s716_s5 = inlined_call_operand.hbm [shape: f32[128,128], index: 5, kind: input, shape index: {}]   ;;  %s717_s6 = inlined_call_operand.vmem [shape: f32[1,128], index: 6, kind: input, shape index: {}]   ;;  %s718_s7 = inlined_call_operand.hbm [shape: f32[8,128], index: 7, kind: output, shape index: {}]  }
   0x1   :  { %13 = vsyncpa [#allocation6], 0 }
   0x2   :  { %14 = vsyncpa [#allocation9], 0 }
   0x3   :  { %15 = vsyncpa [#allocation4], 0  ;;  %s599_s24 = smov [#allocation5]   ;;  %s600_s26 = smov [#allocation2]  }
   0x4   :  { %s32_s25 = sshll.u32 %s599_s24, 4  ;;  %s22_s27 = sshll.u32 %s600_s26, 4  ;;  %s33_s25 = int_to_ptr.vmem [resolvable:$true] %s32_s25  ;;  %s23_s27 = int_to_ptr.vmem [resolvable:$true] %s22_s27 }
   0x5   :  { %s499_s28 = scalar_lea.vmem %s33_s25, 128  ;;  %p504_p1 = scmp.lt.s32.totalorder %s33_s25, %s33_s25 }
   0x6   :  { %p500_p0 = scmp.ne.s32.totalorder %s33_s25, %s499_s28  ;;  %p505_p2 = scmp.lt.s32.totalorder %s499_s28, %s499_s28 }
   0x8   :  { %p506_p3 = por %p505_p2, %p504_p1 }
   0xa   :  { %p507_p4 = pnand %p506_p3, %p500_p0 }
   0xc   :  { %510 = shalt.err (!%p507_p4)
}
   0xd   :  { %35 = dma.hbm_to_vmem [thread:$0]  %s712_s1, 128, %s33_s25, [#allocation6]  }
   0xe   :  { %s519_s8 = scalar_lea.vmem %s23_s27, 128  ;;  %p524_p6 = scmp.lt.s32.totalorder %s23_s27, %s23_s27 }
   0xf   :  { %p520_p5 = scmp.ne.s32.totalorder %s23_s27, %s519_s8  ;;  %p525_p7 = scmp.lt.s32.totalorder %s519_s8, %s519_s8 }
  0x11   :  { %p526_p8 = por %p525_p7, %p524_p6 }
  0x13   :  { %p527_p9 = pnand %p526_p8, %p520_p5 }
  0x15   :  { %530 = shalt.err (!%p527_p9)
}
  0x16   :  { %25 = dma.hbm_to_vmem [thread:$0]  %s711_s0, 128, %s23_s27, [#allocation3]  }
  0x17   :  { %s601_s11 = smov [#allocation7]  }
  0x18   :  { %s43_s12 = sshll.u32 %s601_s11, 4  ;;  %s44_s12 = int_to_ptr.vmem [resolvable:$true] %s43_s12 }
  0x19   :  { %s539_s13 = scalar_lea.vmem %s44_s12, 2048  ;;  %p544_p11 = scmp.lt.s32.totalorder %s44_s12, %s44_s12 }
  0x1a   :  { %p540_p10 = scmp.ne.s32.totalorder %s44_s12, %s539_s13  ;;  %p545_p12 = scmp.lt.s32.totalorder %s539_s13, %s539_s13 }
  0x1c   :  { %p546_p13 = por %p545_p12, %p544_p11 }
  0x1e   :  { %p547_p0 = pnand %p546_p13, %p540_p10 }
  0x20   :  { %550 = shalt.err (!%p547_p0)
}
  0x21   :  { %s602_s1 = smov 128   ;;  %s603_s14 = smov 8  }
  0x22   :  { %49 = dma.hbm_to_vmem [thread:$0]  %s714_s3, 2048, %s44_s12, [#allocation6], %s602_s1, %s602_s1, %s603_s14  }
  0x23   :  { %s604_s17 = smov [#allocation8]  }
  0x24   :  { %s57_s18 = sshll.u32 %s604_s17, 4  ;;  %s58_s18 = int_to_ptr.vmem [resolvable:$true] %s57_s18 }
  0x25   :  { %s559_s0 = scalar_lea.vmem %s58_s18, 2048  ;;  %p564_p2 = scmp.lt.s32.totalorder %s58_s18, %s58_s18 }
  0x26   :  { %p560_p1 = scmp.ne.s32.totalorder %s58_s18, %s559_s0  ;;  %p565_p3 = scmp.lt.s32.totalorder %s559_s0, %s559_s0 }
  0x28   :  { %p566_p4 = por %p565_p3, %p564_p2 }
  0x2a   :  { %p567_p5 = pnand %p566_p4, %p560_p1 }
  0x2c   :  { %570 = shalt.err (!%p567_p5)
}
  0x2d   :  { %63 = dma.hbm_to_vmem [thread:$0]  %s716_s5, 2048, %s58_s18, [#allocation9], %s602_s1, %s602_s1, %s603_s14  }
  0x2e   :  { %591 = dma.done.wait [#allocation3], 128  }
  0x2f   :  { %592 = vsyncadd [#allocation3], 4294967168 }
  0x30   :  { %593 = dma.done.wait [#allocation6], 2176  }
  0x31   :  { %594 = vsyncadd [#allocation6], 4294965120 }
  0x32   :  { %595 = dma.done.wait [#allocation9], 2048  }
  0x33   :  { %596 = vsyncadd [#allocation9], 4294965248  ;;  %v605_v0 = vmov 0.0   ;;  %vm606_vm0 = vmmov 0   ;;  %vm87_vm1 = vcmask 64512   ;;  %v79_v1 = vld [vmem:[#allocation5] sm:$0xff] }
  0x34   :  { %407 = vmatprep.subr.mxu0 %v605_v0  ;;  %409 = vmatprep.mubr.msk.f32.mxu0 %vm606_vm0, %v605_v0  ;;  %v78_v2 = vld [vmem:[#allocation2] sm:$0xff]  ;;  %v177_v3 = vld [vmem:[#allocation7 + $0x78] sm:$0xff]  ;;  %v175_v5 = vld [vmem:[#allocation7 + $0x68] sm:$0xff]  ;;  %s607_s24 = smov [#allocation10]  }
  0x35   :  { %412 = vmatprep.subr.mxu1 %v605_v0  ;;  %444 = vmatprep.mubr.msk.f32.mxu1 %vm606_vm0, %v605_v0  ;;  %v176_v4 = vld [vmem:[#allocation7 + $0x70] sm:$0xff]  ;;  %v174_v6 = vld [vmem:[#allocation7 + $0x60] sm:$0xff]  ;;  %v173_v7 = vld [vmem:[#allocation7 + $0x58] sm:$0xff]  ;;  %s356_s25 = sshll.u32 %s607_s24, 4  ;;  %s357_s25 = int_to_ptr.vmem [resolvable:$true] %s356_s25 }
  0x36   :  { %408 = vmatpush3.msra.mxu0 %v79_v1  ;;  %413 = vmatpush3.msra.mxu1 %v177_v3  ;;  %v172_v8 = vld [vmem:[#allocation7 + $0x50] sm:$0xff]  ;;  %v171_v9 = vld [vmem:[#allocation7 + $0x48] sm:$0xff]  ;;  %v170_v10 = vld [vmem:[#allocation7 + $0x40] sm:$0xff]  ;;  %s571_s26 = scalar_lea.vmem %s357_s25, 128  ;;  %p576_p7 = scmp.lt.s32.totalorder %s357_s25, %s357_s25 }
  0x37   :  { %410 = vmatmul.mubr.msk.f32.vlgmr.msra.gmra.mxu0 %vm87_vm1, %v78_v2  ;;  %414 = vmatprep.subr.mxu1 %v605_v0  ;;  %v169_v11 = vld [vmem:[#allocation7 + $0x38] sm:$0xff]  ;;  %v168_v12 = vld [vmem:[#allocation7 + $0x30] sm:$0xff]  ;;  %v167_v13 = vld [vmem:[#allocation7 + $0x28] sm:$0xff]  ;;  %p572_p6 = scmp.ne.s32.totalorder %s357_s25, %s571_s26  ;;  %p577_p8 = scmp.lt.s32.totalorder %s571_s26, %s571_s26 }
  0x38   :  { %415 = vmatpush3.msra.mxu1 %v176_v4  ;;  %447 = vmatprep.subr.mxu0 %v605_v0  ;;  %v166_v14 = vld [vmem:[#allocation7 + $0x20] sm:$0xff]  ;;  %v165_v15 = vld [vmem:[#allocation7 + $0x18] sm:$0xff]  ;;  %v164_v16 = vld [vmem:[#allocation7 + $0x10] sm:$0xff] }
  0x39   :  { %416 = vmatprep.subr.mxu1 %v605_v0  ;;  %479 = vmatprep.mubr.msk.f32.mxu0 %vm606_vm0, %v605_v0  ;;  %v163_v17 = vld [vmem:[#allocation7 + $0x8] sm:$0xff]  ;;  %v162_v18 = vld [vmem:[#allocation7] sm:$0xff]  ;;  %v271_v19 = vld [vmem:[#allocation8 + $0x78] sm:$0xff]  ;;  %p578_p9 = por %p577_p8, %p576_p7 }
  0x3a   :  { %417 = vmatpush3.msra.mxu1 %v175_v5  ;;  %v270_v20 = vld [vmem:[#allocation8 + $0x70] sm:$0xff]  ;;  %448 = vmatpush3.msra.mxu0 %v271_v19  ;;  %v269_v21 = vld [vmem:[#allocation8 + $0x68] sm:$0xff]  ;;  %v268_v22 = vld [vmem:[#allocation8 + $0x60] sm:$0xff] }
  0x3b   :  { %418 = vmatprep.subr.mxu1 %v605_v0  ;;  %449 = vmatprep.subr.mxu0 %v605_v0  ;;  %v267_v23 = vld [vmem:[#allocation8 + $0x58] sm:$0xff]  ;;  %v266_v24 = vld [vmem:[#allocation8 + $0x50] sm:$0xff]  ;;  %v265_v25 = vld [vmem:[#allocation8 + $0x48] sm:$0xff]  ;;  %p579_p10 = pnand %p578_p9, %p572_p6 }
  0x3c   :  { %419 = vmatpush3.msra.mxu1 %v174_v6  ;;  %450 = vmatpush3.msra.mxu0 %v270_v20  ;;  %v264_v26 = vld [vmem:[#allocation8 + $0x40] sm:$0xff]  ;;  %v263_v27 = vld [vmem:[#allocation8 + $0x38] sm:$0xff]  ;;  %v262_v28 = vld [vmem:[#allocation8 + $0x30] sm:$0xff] }
  0x3d   :  { %420 = vmatprep.subr.mxu1 %v605_v0  ;;  %451 = vmatprep.subr.mxu0 %v605_v0  ;;  %v261_v29 = vld [vmem:[#allocation8 + $0x28] sm:$0xff]  ;;  %v260_v30 = vld [vmem:[#allocation8 + $0x20] sm:$0xff]  ;;  %v259_v31 = vld [vmem:[#allocation8 + $0x18] sm:$0xff] }
  0x3e   :  { %421 = vmatpush3.msra.mxu1 %v173_v7  ;;  %452 = vmatpush3.msra.mxu0 %v269_v21  ;;  %v367_v32 = vld [vmem:[%s713_s2] ss:$0 sm:$0xff]  ;;  %v257_v38 = vld [vmem:[#allocation8 + $0x8] sm:$0xff]  ;;  %v256_v39 = vld [vmem:[#allocation8] sm:$0xff] }
  0x3f   :  { %422 = vmatprep.subr.mxu1 %v605_v0  ;;  %453 = vmatprep.subr.mxu0 %v605_v0  ;;  %v258_v37 = vld [vmem:[#allocation8 + $0x10] sm:$0xff] }
  0x40   :  { %423 = vmatpush3.msra.mxu1 %v172_v8  ;;  %454 = vmatpush3.msra.mxu0 %v268_v22  ;;  %v369_v40 = vld [vmem:[%s715_s4] ss:$0 sm:$0xff] }
  0x41   :  { %424 = vmatprep.subr.mxu1 %v605_v0  ;;  %455 = vmatprep.subr.mxu0 %v605_v0  ;;  %v370_v45 = vld [vmem:[%s717_s6] ss:$0 sm:$0xff] }
  0x42   :  { %425 = vmatpush3.msra.mxu1 %v171_v9  ;;  %456 = vmatpush3.msra.mxu0 %v267_v23 }
  0x43   :  { %426 = vmatprep.subr.mxu1 %v605_v0  ;;  %457 = vmatprep.subr.mxu0 %v605_v0 }
  0x44   :  { %427 = vmatpush3.msra.mxu1 %v170_v10  ;;  %458 = vmatpush3.msra.mxu0 %v266_v24 }
  0x45   :  { %428 = vmatprep.subr.mxu1 %v605_v0  ;;  %459 = vmatprep.subr.mxu0 %v605_v0 }
  0x46   :  { %429 = vmatpush3.msra.mxu1 %v169_v11  ;;  %460 = vmatpush3.msra.mxu0 %v265_v25 }
  0x47   :  { %430 = vmatprep.subr.mxu1 %v605_v0  ;;  %461 = vmatprep.subr.mxu0 %v605_v0 }
  0x48   :  { %431 = vmatpush3.msra.mxu1 %v168_v12  ;;  %462 = vmatpush3.msra.mxu0 %v264_v26 }
  0x49   :  { %432 = vmatprep.subr.mxu1 %v605_v0  ;;  %463 = vmatprep.subr.mxu0 %v605_v0 }
  0x4a   :  { %433 = vmatpush3.msra.mxu1 %v167_v13  ;;  %464 = vmatpush3.msra.mxu0 %v263_v27 }
  0x4b   :  { %434 = vmatprep.subr.mxu1 %v605_v0  ;;  %465 = vmatprep.subr.mxu0 %v605_v0 }
  0x4c   :  { %435 = vmatpush3.msra.mxu1 %v166_v14  ;;  %466 = vmatpush3.msra.mxu0 %v262_v28 }
  0x4d   :  { %436 = vmatprep.subr.mxu1 %v605_v0  ;;  %467 = vmatprep.subr.mxu0 %v605_v0 }
  0x4e   :  { %437 = vmatpush3.msra.mxu1 %v165_v15  ;;  %468 = vmatpush3.msra.mxu0 %v261_v29 }
  0x4f   :  { %438 = vmatprep.subr.mxu1 %v605_v0  ;;  %469 = vmatprep.subr.mxu0 %v605_v0 }
  0x50   :  { %439 = vmatpush3.msra.mxu1 %v164_v16  ;;  %470 = vmatpush3.msra.mxu0 %v260_v30 }
  0x51   :  { %440 = vmatprep.subr.mxu1 %v605_v0  ;;  %471 = vmatprep.subr.mxu0 %v605_v0 }
  0x52   :  { %441 = vmatpush3.msra.mxu1 %v163_v17  ;;  %472 = vmatpush3.msra.mxu0 %v259_v31 }
  0x53   :  { %442 = vmatprep.subr.mxu1 %v605_v0  ;;  %473 = vmatprep.subr.mxu0 %v605_v0 }
  0x54   :  { %443 = vmatpush3.msra.mxu1 %v162_v18  ;;  %474 = vmatpush3.msra.mxu0 %v258_v37 }
  0x55   :  { %475 = vmatprep.subr.mxu0 %v605_v0 }
  0x56   :  { %476 = vmatpush3.msra.mxu0 %v257_v38 }
  0x57   :  { %477 = vmatprep.subr.mxu0 %v605_v0 }
  0x58   :  { %478 = vmatpush3.msra.mxu0 %v256_v39 }
  0xf7   :  { %v157_v33 = vpop.f32.mrf.mxu0 }
  0xf8   :  { %v158_v34 = vadd.f32 %v367_v32, %v157_v33 }
  0xf9   :  { %v411_v35 = vpop.f32.mrf.mxu0 }
  0xfa   :  { %v161_v36 = vmax.f32 %v158_v34, 0.0 }
  0xfc   :  { %445 = vmatmul.mubr.f32.vlgmr.msra.gmra.mxu1 %v161_v36 }
 0x1bc   :  { %v251_v41 = vpop.f32.mrf.mxu1 }
 0x1bd   :  { %v252_v42 = vadd.f32 %v369_v40, %v251_v41 }
 0x1be   :  { %v446_v43 = vpop.f32.mrf.mxu1 }
 0x1bf   :  { %v255_v44 = vmax.f32 %v252_v42, 0.0 }
 0x1c1   :  { %480 = vmatmul.mubr.f32.vlgmr.msra.gmra.mxu0 %v255_v44 }
 0x281   :  { %v345_v46 = vpop.f32.mrf.mxu0 }
 0x282   :  { %v346_v47 = vadd.f32 %v370_v45, %v345_v46 }
 0x283   :  { %v481_v48 = vpop.f32.mrf.mxu0 }
 0x284   :  { %349 = vst [vmem:[#allocation10] sm:$0xff] %v346_v47 }
 0x285   :  { %582 = shalt.err (!%p579_p10)
}
 0x286   :  { %359 = dma.vmem_to_hbm [thread:$0]  %s357_s25, 128, %s718_s7, [#allocation4]  }
 0x287   :  { %597 = dma.done.wait [#allocation4], 128  }
 0x288   :  { %598 = vsyncadd [#allocation4], 4294967168 }
 0x289   :  { %363 = vsyncpa [#allocation3], 1 }
 0x28a   :  { %364 = vsyncpa [#allocation6], 1 }
 0x28b   :  { %365 = vsyncpa [#allocation9], 1 }
 0x28c   :  { %366 = vsyncpa [#allocation4], 1 }

</bundles_post_ra>
